<compile_context>
chip_gen: v6e
topology: v6e:2x2x1
jax: 0.10.0
libtpu: 0.0.40
codegen_flags: <defaults>
</compile_context>

<pallas_src>
import functools

import jax
import jax.numpy as jnp
from jax.experimental import pallas as pl
from jax.experimental.pallas import tpu as pltpu


def _round_up(v, m):
    return ((v + m - 1) // m) * m


def _pick_k_tile(k_pad, cap):
    """Largest multiple of 128 that is <= cap and divides k_pad."""
    t = min(cap, k_pad)
    t = max((t // 128) * 128, 128)
    while k_pad % t:
        t -= 128
    return t


# ----------------------------- Pallas kernels -----------------------------

def conv_gemm_stats_kernel(p_ref, w_ref, y_ref, sum_ref, sq_ref, acc_ref, *,
                           tk, k_tiles, resident_w):
    # p_ref: (TM, TK) bf16 im2col patches
    # w_ref: (TK, P) bf16 weight block, or the full (K_pad, P) resident weight
    # y_ref: (TM, P) bf16 conv output tile
    # sum_ref / sq_ref: (1, 1, P) f32 per-M-tile partial BN statistics
    # acc_ref: (TM, P) f32 scratch accumulator for the K reduction.
    kk = pl.program_id(1)

    @pl.when(kk == 0)
    def _():
        acc_ref[...] = jnp.zeros_like(acc_ref)

    if resident_w and k_tiles > 1:
        off = pl.multiple_of(kk * tk, 128)
        w = w_ref[pl.ds(off, tk), :]
    else:
        w = w_ref[...]
    acc_ref[...] += jnp.dot(p_ref[...], w, preferred_element_type=jnp.float32)

    @pl.when(kk == pl.num_programs(1) - 1)
    def _():
        y = acc_ref[...]
        y_ref[...] = y.astype(y_ref.dtype)
        # Zero-padded rows / channels contribute 0 -> stats stay correct;
        # the wrapper divides by the true M after summing the per-tile
        # partials.  Per-tile partials (indexed by the M grid axis) keep the
        # M axis free of cross-tile writes, so it can be "parallel".
        sum_ref[...] = jnp.sum(y, axis=0, keepdims=True)[None]
        sq_ref[...] = jnp.sum(y * y, axis=0, keepdims=True)[None]


def bn_mish_kernel(y_ref, scale_ref, bias_ref, o_ref, *, active):
    # BN folded to z = y*scale + bias; Mish with a single exp:
    #   tanh(softplus(z)) = t*(t+2) / (t*(t+2) + 2),  t = exp(z)
    z = y_ref[...].astype(jnp.float32) * scale_ref[...] + bias_ref[...]
    if active:
        t = jnp.exp(jnp.minimum(z, 20.0))          # clamp: keep finite
        num = t * (t + 2.0)
        # EUP approximate reciprocal keeps the divide off the VALU slots.
        mish = z * (num * pl.reciprocal(num + 2.0, approx=True))
        z = jnp.where(z > 20.0, z, mish)           # tanh(softplus(z>20)) == 1
    o_ref[...] = z.astype(o_ref.dtype)


# ----------------------------- Host-side glue ------------------------------

def _im2col(x, kh, kw, stride, padding):
    """x: (N, C, H, W) -> patches (N*OH*OW, C*kh*kw), matching PyTorch's
    (C, kh, kw) row-major flattening of the conv weight."""
    # TODO(synk): fold the (kh,kw) taps into the Pallas K-reduction axis
    # (manual shifted NHWC window DMAs) to avoid materializing the ~9x
    # im2col array in HBM -- dominant HBM cost for 3x3/stride-1 layers.
    n, c, h, w = x.shape
    if padding > 0:
        x = jnp.pad(x, ((0, 0), (0, 0), (padding, padding), (padding, padding)))
    oh = (h + 2 * padding - kh) // stride + 1
    ow = (w + 2 * padding - kw) // stride + 1
    pieces = []
    for i in range(kh):
        for j in range(kw):
            pieces.append(x[:, :, i:i + stride * oh:stride,
                             j:j + stride * ow:stride])
    p = jnp.stack(pieces, axis=2).reshape(n, c * kh * kw, oh, ow)
    p = p.transpose(0, 2, 3, 1).reshape(n * oh * ow, c * kh * kw)
    return p, oh, ow


def base_block_forward(x, conv_weight, gamma, beta, *, stride=1, padding=0,
                       active=True, eps=1e-5, tm=None, tk=512,
                       nhwc_out=False):
    """x: (N, C_in, H, W) float32.  conv_weight: (C_out, C_in, KH, KW).
    Returns (N, C_out, OH, OW) float32 (or NHWC when nhwc_out=True, which
    skips the trailing full read+write layout transpose)."""
    n, c_in, _, _ = x.shape
    c_out, _, kh, kw = conv_weight.shape
    k = c_in * kh * kw

    # bf16 GEMM inputs (f32 accumulation in-kernel): full MXU rate on
    # v5e/v6e/v7x and half the patch/weight HBM traffic.
    patches, oh, ow = _im2col(x.astype(jnp.bfloat16), kh, kw, stride, padding)
    m = patches.shape[0]

    # Lane-dense padding: K and P to multiples of 128.  The row tile shrinks
    # to ~M for small inputs (sublane dim only needs a multiple of 16 for
    # bf16 blocks) so tiny layers don't pad 30% dead rows.
    k_pad = _round_up(k, 128)
    p_pad = _round_up(c_out, 128)
    tk = _pick_k_tile(k_pad, tk)
    k_tiles = k_pad // tk
    if tm is None:
        tm = 1024 if p_pad <= 256 else 512   # bigger row tiles amortize
    tm = min(tm, _round_up(m, 16))           # per-grid-step overhead
    m_pad = _round_up(m, tm)
    m_tiles = m_pad // tm

    patches = jnp.pad(patches, ((0, m_pad - m), (0, k_pad - k)))
    w_mat = jnp.pad(conv_weight.reshape(c_out, k).T.astype(jnp.bfloat16),
                    ((0, k_pad - k), (0, p_pad - c_out)))

    # Hold the whole weight resident in VMEM when it is small enough; with
    # a per-K-step weight block the full weight would be re-DMA'd once per
    # M tile.
    resident_w = (2 * k_pad * p_pad * 2) <= (8 << 20)

    # VMEM budget (double-buffered inputs/outputs + f32 accumulator
    # scratch), clamped to 48 MiB so v7x's 64 MiB physical VMEM keeps
    # headroom for compiler scratch / descriptors.
    w_block_elems = (k_pad * p_pad) if resident_w else (tk * p_pad)
    needed_p1 = (2 * tm * tk * 2            # patches blocks (bf16)
                 + 2 * w_block_elems * 2    # weight (bf16)
                 + 2 * tm * p_pad * 2       # y output blocks (bf16)
                 + 2 * 2 * p_pad * 4        # stats outputs (f32)
                 + tm * p_pad * 4)          # f32 accumulator scratch
    needed_p2 = (2 * tm * p_pad * 2         # y input (bf16)
                 + 2 * 2 * p_pad * 4        # scale/bias
                 + 2 * tm * p_pad * 4)      # f32 output
    vmem_limit = int(min(max(max(needed_p1, needed_p2) + (4 << 20), 32 << 20),
                         48 << 20))

    if resident_w:
        w_spec = pl.BlockSpec((k_pad, p_pad), lambda i, kk: (0, 0))
    else:
        w_spec = pl.BlockSpec((tk, p_pad), lambda i, kk: (kk, 0))

    # ---- pass 1: fused conv GEMM + per-tile BN statistics ----
    y, sums, sqs = pl.pallas_call(
        functools.partial(conv_gemm_stats_kernel, tk=tk, k_tiles=k_tiles,
                          resident_w=resident_w),
        out_shape=(jax.ShapeDtypeStruct((m_pad, p_pad), jnp.bfloat16),
                   jax.ShapeDtypeStruct((m_tiles, 1, p_pad), jnp.float32),
                   jax.ShapeDtypeStruct((m_tiles, 1, p_pad), jnp.float32)),
        grid=(m_tiles, k_tiles),
        in_specs=[pl.BlockSpec((tm, tk), lambda i, kk: (i, kk)),
                  w_spec],
        out_specs=(pl.BlockSpec((tm, p_pad), lambda i, kk: (i, 0)),
                   pl.BlockSpec((1, 1, p_pad), lambda i, kk: (i, 0, 0)),
                   pl.BlockSpec((1, 1, p_pad), lambda i, kk: (i, 0, 0))),
        scratch_shapes=[pltpu.VMEM((tm, p_pad), jnp.float32)],
        compiler_params=pltpu.CompilerParams(
            dimension_semantics=("parallel", "arbitrary"),
            vmem_limit_bytes=vmem_limit),
    )(patches, w_mat)

    # ---- fold BN into scale/bias (O(m_tiles*p_pad) wrapper math) ----
    col_sum = jnp.sum(sums, axis=(0, 1))
    col_sq = jnp.sum(sqs, axis=(0, 1))
    mean = col_sum / m
    # NOTE: E[y^2]-E[y]^2 in f32; fine at these sizes, switch to a shifted /
    # two-pass variance if activations grow large enough to cancel.
    var = jnp.maximum(col_sq / m - mean * mean, 0.0)
    inv_std = jax.lax.rsqrt(var + eps)
    gamma_p = jnp.pad(gamma.astype(jnp.float32), (0, p_pad - c_out))
    beta_p = jnp.pad(beta.astype(jnp.float32), (0, p_pad - c_out))
    scale = (gamma_p * inv_std).reshape(1, p_pad)
    bias = (beta_p - mean * gamma_p * inv_std).reshape(1, p_pad)

    # ---- pass 2: normalize (folded) + Mish ----
    # TODO(synk): if downstream tolerates bf16, emit bf16 and alias y->out
    # (input_output_aliases) to halve the write traffic / drop a buffer.
    out = pl.pallas_call(
        functools.partial(bn_mish_kernel, active=active),
        out_shape=jax.ShapeDtypeStruct((m_pad, p_pad), jnp.float32),
        grid=(m_tiles,),
        in_specs=[pl.BlockSpec((tm, p_pad), lambda i: (i, 0)),
                  pl.BlockSpec((1, p_pad), lambda i: (0, 0)),
                  pl.BlockSpec((1, p_pad), lambda i: (0, 0))],
        out_specs=pl.BlockSpec((tm, p_pad), lambda i: (i, 0)),
        compiler_params=pltpu.CompilerParams(
            dimension_semantics=("parallel",),
            vmem_limit_bytes=vmem_limit),
    )(y, scale, bias)

    out = out[:m, :c_out].reshape(n, oh, ow, c_out)
    if not nhwc_out:
        out = out.transpose(0, 3, 1, 2)   # match PyTorch NCHW
    return out


# ----------------------------- Reference (plain JAX) -----------------------

def reference_forward(x, conv_weight, gamma, beta, *, stride=1, padding=0,
                      active=True, eps=1e-5):
    y = jax.lax.conv_general_dilated(
        x, conv_weight, window_strides=(stride, stride),
        padding=[(padding, padding), (padding, padding)],
        dimension_numbers=('NCHW', 'OIHW', 'NCHW'))
    mean = jnp.mean(y, axis=(0, 2, 3), keepdims=True)
    var = jnp.mean((y - mean) ** 2, axis=(0, 2, 3), keepdims=True)
    z = (y - mean) / jnp.sqrt(var + eps)
    z = z * gamma.reshape(1, -1, 1, 1) + beta.reshape(1, -1, 1, 1)
    if active:
        z = z * jnp.tanh(jax.nn.softplus(z))
    return z


# ----------------------------- Main ----------------------------------------

if __name__ == "__main__":
    # BaseBlock(inplanes=4, planes=8, kernel_size=3, stride=1, padding=0,
    #           active=True)
    N, C_IN, H, W = 2, 4, 16, 16
    C_OUT, KH, KW = 8, 3, 3
    STRIDE, PADDING, ACTIVE = 1, 0, True

    key = jax.random.PRNGKey(0)
    k_x, k_w, k_g, k_b = jax.random.split(key, 4)
    x = jax.random.normal(k_x, (N, C_IN, H, W), dtype=jnp.float32)
    conv_w = jax.random.normal(k_w, (C_OUT, C_IN, KH, KW),
                               dtype=jnp.float32) * 0.1
    gamma = 1.0 + 0.1 * jax.random.normal(k_g, (C_OUT,), dtype=jnp.float32)
    beta = 0.1 * jax.random.normal(k_b, (C_OUT,), dtype=jnp.float32)

    out = base_block_forward(x, conv_w, gamma, beta, stride=STRIDE,
                             padding=PADDING, active=ACTIVE)
    out = jax.block_until_ready(out)

    ref = reference_forward(x, conv_w, gamma, beta, stride=STRIDE,
                            padding=PADDING, active=ACTIVE)
    assert out.shape == ref.shape, (out.shape, ref.shape)
    # bf16 GEMM inputs + bf16 y intermediate => ~1e-2 absolute error budget
    # on the BN-normalized output (the f32 reference is exact).
    max_err = float(jnp.max(jnp.abs(out - ref)))
    assert jnp.allclose(out, ref, rtol=2e-2, atol=2e-2), max_err

    print("KERNEL_OK")
</pallas_src>

<mosaic_0001>
module attributes {stable_mosaic.version = 11 : i64} {
  func.func @conv_gemm_stats_kernel(%arg0: i32, %arg1: i32, %arg2: memref<400x128xbf16, #tpu.memory_space<vmem>>, %arg3: memref<128x128xbf16, #tpu.memory_space<vmem>>, %arg4: memref<400x128xbf16, #tpu.memory_space<vmem>>, %arg5: memref<1x1x128xf32, #tpu.memory_space<vmem>>, %arg6: memref<1x1x128xf32, #tpu.memory_space<vmem>>, %arg7: memref<400x128xf32, #tpu.memory_space<vmem>>) attributes {dimension_semantics = [#tpu.dimension_semantics<parallel>, #tpu.dimension_semantics<arbitrary>], iteration_bounds = array<i64: 1, 1>, scalar_prefetch = 0 : i64, scratch_operands = 1 : i64, tpu.core_type = #tpu.core_type<tc>, window_params = [{transform_indices = @transform_0, window_bounds = array<i64: 400, 128>}, {pipeline_mode = #tpu.pipeline_mode<synchronous>, transform_indices = @transform_1, window_bounds = array<i64: 128, 128>}, {transform_indices = @transform_2, window_bounds = array<i64: 400, 128>}, {transform_indices = @transform_3, window_bounds = array<i64: 1, 1, 128>}, {transform_indices = @transform_4, window_bounds = array<i64: 1, 1, 128>}]} {
    %c0_i32 = arith.constant 0 : i32
    %0 = arith.cmpi eq, %arg1, %c0_i32 : i32
    %1 = arith.extui %0 : i1 to i32
    %c0_i32_0 = arith.constant 0 : i32
    %2 = arith.cmpi ne, %1, %c0_i32_0 : i32
    scf.if %2 {
      %cst_10 = arith.constant 0.000000e+00 : f32
      %12 = vector.broadcast %cst_10 : f32 to vector<400x128xf32>
      %c0_11 = arith.constant 0 : index
      %c0_12 = arith.constant 0 : index
      %13 = vector.load %arg7[%c0_11, %c0_12] : memref<400x128xf32, #tpu.memory_space<vmem>>, vector<400x128xf32>
      tpu.vector_store %arg7[%c0_11, %c0_12], %12 {strides = array<i32>} : memref<400x128xf32, #tpu.memory_space<vmem>>, vector<400x128xf32>,
    } else {
    }
    %c0 = arith.constant 0 : index
    %c0_1 = arith.constant 0 : index
    %3 = vector.load %arg3[%c0, %c0_1] : memref<128x128xbf16, #tpu.memory_space<vmem>>, vector<128x128xbf16>
    %c0_2 = arith.constant 0 : index
    %c0_3 = arith.constant 0 : index
    %4 = vector.load %arg7[%c0_2, %c0_3] : memref<400x128xf32, #tpu.memory_space<vmem>>, vector<400x128xf32>
    %c0_4 = arith.constant 0 : index
    %c0_5 = arith.constant 0 : index
    %5 = vector.load %arg2[%c0_4, %c0_5] : memref<400x128xbf16, #tpu.memory_space<vmem>>, vector<400x128xbf16>
    %cst = arith.constant dense<0.000000e+00> : vector<400x128xf32>
    %6 = tpu.matmul %5, %3, %cst {dimension_numbers = #tpu.dot_dimension_numbers<[1], [0], [0], [1], [0, 0, 1, 1], [], []>} : vector<400x128xbf16>, vector<128x128xbf16>, vector<400x128xf32> -> vector<400x128xf32>
    %7 = arith.addf %4, %6 : vector<400x128xf32>
    %c0_6 = arith.constant 0 : index
    %c0_7 = arith.constant 0 : index
    %8 = vector.load %arg7[%c0_6, %c0_7] : memref<400x128xf32, #tpu.memory_space<vmem>>, vector<400x128xf32>
    tpu.vector_store %arg7[%c0_6, %c0_7], %7 {strides = array<i32>} : memref<400x128xf32, #tpu.memory_space<vmem>>, vector<400x128xf32>,
    %c0_i32_8 = arith.constant 0 : i32
    %9 = arith.cmpi eq, %arg1, %c0_i32_8 : i32
    %10 = arith.extui %9 : i1 to i32
    %c0_i32_9 = arith.constant 0 : i32
    %11 = arith.cmpi ne, %10, %c0_i32_9 : i32
    scf.if %11 {
      %c0_10 = arith.constant 0 : index
      %c0_11 = arith.constant 0 : index
      %12 = vector.load %arg7[%c0_10, %c0_11] : memref<400x128xf32, #tpu.memory_space<vmem>>, vector<400x128xf32>
      %13 = arith.truncf %12 : vector<400x128xf32> to vector<400x128xbf16>
      %c0_12 = arith.constant 0 : index
      %c0_13 = arith.constant 0 : index
      %14 = vector.load %arg4[%c0_12, %c0_13] : memref<400x128xbf16, #tpu.memory_space<vmem>>, vector<400x128xbf16>
      tpu.vector_store %arg4[%c0_12, %c0_13], %13 {strides = array<i32>} : memref<400x128xbf16, #tpu.memory_space<vmem>>, vector<400x128xbf16>,
      %cst_14 = arith.constant dense<0.000000e+00> : vector<128xf32>
      %15 = vector.multi_reduction <add>, %12, %cst_14 [0] : vector<400x128xf32> to vector<128xf32>
      %16 = vector.shape_cast %15 : vector<128xf32> to vector<1x128xf32>
      %17 = vector.shape_cast %16 : vector<1x128xf32> to vector<1x1x128xf32>
      %c0_15 = arith.constant 0 : index
      %c0_16 = arith.constant 0 : index
      %c0_17 = arith.constant 0 : index
      %18 = vector.load %arg5[%c0_15, %c0_16, %c0_17] : memref<1x1x128xf32, #tpu.memory_space<vmem>>, vector<1x1x128xf32>
      tpu.vector_store %arg5[%c0_15, %c0_16, %c0_17], %17 {strides = array<i32>} : memref<1x1x128xf32, #tpu.memory_space<vmem>>, vector<1x1x128xf32>,
      %19 = arith.mulf %12, %12 : vector<400x128xf32>
      %cst_18 = arith.constant dense<0.000000e+00> : vector<128xf32>
      %20 = vector.multi_reduction <add>, %19, %cst_18 [0] : vector<400x128xf32> to vector<128xf32>
      %21 = vector.shape_cast %20 : vector<128xf32> to vector<1x128xf32>
      %22 = vector.shape_cast %21 : vector<1x128xf32> to vector<1x1x128xf32>
      %c0_19 = arith.constant 0 : index
      %c0_20 = arith.constant 0 : index
      %c0_21 = arith.constant 0 : index
      %23 = vector.load %arg6[%c0_19, %c0_20, %c0_21] : memref<1x1x128xf32, #tpu.memory_space<vmem>>, vector<1x1x128xf32>
      tpu.vector_store %arg6[%c0_19, %c0_20, %c0_21], %22 {strides = array<i32>} : memref<1x1x128xf32, #tpu.memory_space<vmem>>, vector<1x1x128xf32>,
    } else {
    }
    return
  }
  func.func @transform_0(%arg0: i32, %arg1: i32) -> (i32, i32) {
    %c0_i32 = arith.constant 0 : i32
    return %arg0, %arg1 : i32, i32
  }
  func.func @transform_1(%arg0: i32, %arg1: i32) -> (i32, i32) {
    %c0_i32 = arith.constant 0 : i32
    %c0_i32_0 = arith.constant 0 : i32
    %c0_i32_1 = arith.constant 0 : i32
    return %c0_i32, %c0_i32_0 : i32, i32
  }
  func.func @transform_2(%arg0: i32, %arg1: i32) -> (i32, i32) {
    %c0_i32 = arith.constant 0 : i32
    %c0_i32_0 = arith.constant 0 : i32
    return %arg0, %c0_i32 : i32, i32
  }
  func.func @transform_3(%arg0: i32, %arg1: i32) -> (i32, i32, i32) {
    %c0_i32 = arith.constant 0 : i32
    %c0_i32_0 = arith.constant 0 : i32
    %c0_i32_1 = arith.constant 0 : i32
    return %arg0, %c0_i32, %c0_i32_0 : i32, i32, i32
  }
  func.func @transform_4(%arg0: i32, %arg1: i32) -> (i32, i32, i32) {
    %c0_i32 = arith.constant 0 : i32
    %c0_i32_0 = arith.constant 0 : i32
    %c0_i32_1 = arith.constant 0 : i32
    return %arg0, %c0_i32, %c0_i32_0 : i32, i32, i32
  }
}

</mosaic_0001>

<bundles_post_ra>
// kernel: tpu_custom_call.1
= control target key start
LH: loop header
LB: loop body
LE: loop exit
PB: predicated region body
PF: predicated region fallthrough
CT: control target
= control target key end

     0   :  { %10 = vsyncpa [#allocation4], 0  ;;  %s2217_s0 = inlined_call_operand.hbm [shape: bf16[400,128], index: 0, kind: input, shape index: {}]   ;;  %s2218_s1 = inlined_call_operand.hbm [shape: bf16[128,128], index: 1, kind: input, shape index: {}]   ;;  %s2219_s2 = inlined_call_operand.hbm [shape: bf16[400,128], index: 2, kind: output, shape index: {0}]   ;;  %s2220_s3 = inlined_call_operand.hbm [shape: f32[1,1,128], index: 3, kind: output, shape index: {1}]   ;;  %s2221_s4 = inlined_call_operand.hbm [shape: f32[1,1,128], index: 4, kind: output, shape index: {2}]  }
   0x1   :  { %11 = vsyncpa [#allocation7], 0 }
   0x2   :  { %12 = vsyncpa [#allocation5], 0 }
   0x3   :  { %13 = vsyncpa [#allocation10], 0  ;;  %s1853_s15 = smov [#allocation3]  }
   0x4   :  { %s19_s16 = sshll.u32 %s1853_s15, 4  ;;  %s20_s16 = int_to_ptr.vmem [resolvable:$true] %s19_s16 }
   0x5   :  { %s1753_s17 = scalar_lea.vmem %s20_s16, 3200  ;;  %p1758_p1 = scmp.lt.s32.totalorder %s20_s16, %s20_s16 }
   0x6   :  { %p1754_p0 = scmp.ne.s32.totalorder %s20_s16, %s1753_s17  ;;  %p1759_p2 = scmp.lt.s32.totalorder %s1753_s17, %s1753_s17 }
   0x8   :  { %p1760_p3 = por %p1759_p2, %p1758_p1 }
   0xa   :  { %p1761_p4 = pnand %p1760_p3, %p1754_p0 }
   0xc   :  { %1764 = shalt.err (!%p1761_p4)
}
   0xd   :  { %s1854_s18 = smov 64   ;;  %s1855_s19 = smov 4  }
   0xe   :  { %25 = dma.hbm_to_vmem [thread:$0]  %s2217_s0, 3200, %s20_s16, [#allocation4], %s1854_s18, %s1854_s18, %s1855_s19  }
   0xf   :  { %s1856_s22 = smov [#allocation6]  }
  0x10   :  { %s31_s23 = sshll.u32 %s1856_s22, 4  ;;  %s32_s23 = int_to_ptr.vmem [resolvable:$true] %s31_s23 }
  0x11   :  { %s1773_s24 = scalar_lea.vmem %s32_s23, 1024  ;;  %p1778_p6 = scmp.lt.s32.totalorder %s32_s23, %s32_s23 }
  0x12   :  { %p1774_p5 = scmp.ne.s32.totalorder %s32_s23, %s1773_s24  ;;  %p1779_p7 = scmp.lt.s32.totalorder %s1773_s24, %s1773_s24 }
  0x14   :  { %p1780_p8 = por %p1779_p7, %p1778_p6 }
  0x16   :  { %p1781_p9 = pnand %p1780_p8, %p1774_p5 }
  0x18   :  { %1784 = shalt.err (!%p1781_p9)
}
  0x19   :  { %37 = dma.hbm_to_vmem [thread:$0]  %s2218_s1, 1024, %s32_s23, [#allocation7], %s1854_s18, %s1854_s18, %s1855_s19  }
  0x1a   :  { %1845 = dma.done.wait [#allocation4], 3200  }
  0x1b   :  { %1846 = vsyncadd [#allocation4], 4294964096 }
  0x1c   :  { %1847 = dma.done.wait [#allocation7], 1024  }
  0x1d   :  { %1848 = vsyncadd [#allocation7], 4294966272  ;;  %v1857_v0 = vmov 0.0   ;;  %vm1858_vm0 = vmmov 0   ;;  %v1712_v1 = vld [vmem:[#allocation6 + $0x38] sm:$0xff]   ;;  %v1713_v2 = vld [vmem:[#allocation6 + $0x30] sm:$0xff]  }
  0x1e   :  { %1571 = vmatprep.subr.bf16.mxu0 %v1857_v0  ;;  %1587 = vmatprep.mubr.msk.bf16.mxu0 %vm1858_vm0, %v1857_v0  ;;  %v1714_v3 = vld [vmem:[#allocation6 + $0x28] sm:$0xff]   ;;  %v1715_v4 = vld [vmem:[#allocation6 + $0x20] sm:$0xff]   ;;  %v1716_v5 = vld [vmem:[#allocation6 + $0x18] sm:$0xff]   ;;  %s1859_s0 = smov [#allocation8]  }
  0x1f   :  { %1687 = vmatprep.subr.bf16.mxu1 %v1857_v0  ;;  %1639 = vmatprep.mubr.msk.bf16.mxu1 %vm1858_vm0, %v1857_v0  ;;  %v1717_v6 = vld [vmem:[#allocation6 + $0x10] sm:$0xff]   ;;  %v1718_v7 = vld [vmem:[#allocation6 + $0x8] sm:$0xff]   ;;  %v1719_v8 = vld [vmem:[#allocation6] sm:$0xff]   ;;  %s1216_s1 = sshll.u32 %s1859_s0, 4  ;;  %s1217_s1 = int_to_ptr.vmem [resolvable:$true] %s1216_s1 }
  0x20   :  { %1572 = vmatpush3.bf16.msra.mxu0 %v1712_v1  ;;  %1695 = vmatpush3.bf16.msra.mxu1 %v1712_v1  ;;  %v1720_v9 = vld [vmem:[#allocation3] sm:$0xff]   ;;  %v1727_v10 = vld [vmem:[#allocation3 + $0x68] sm:$0xff]   ;;  %v1729_v12 = vld [vmem:[#allocation3 + $0x70] sm:$0xff]   ;;  %s1785_s27 = scalar_lea.vmem %s1217_s1, 3200  ;;  %p1790_p11 = scmp.lt.s32.totalorder %s1217_s1, %s1217_s1 }
  0x21   :  { %1573 = vmatprep.subr.bf16.mxu0 %v1857_v0  ;;  %1688 = vmatprep.subr.bf16.mxu1 %v1857_v0  ;;  %v1721_v11 = vld [vmem:[#allocation3 + $0x8] sm:$0xff]   ;;  %v1722_v13 = vld [vmem:[#allocation3 + $0x10] sm:$0xff]   ;;  %v1731_v14 = vld [vmem:[#allocation3 + $0x78] sm:$0xff]   ;;  %p1786_p10 = scmp.ne.s32.totalorder %s1217_s1, %s1785_s27  ;;  %p1791_p12 = scmp.lt.s32.totalorder %s1785_s27, %s1785_s27 }
  0x22   :  { %v1723_v15 = vld [vmem:[#allocation3 + $0x18] sm:$0xff]   ;;  %v1733_v16 = vld [vmem:[#allocation3 + $0x80] sm:$0xff]   ;;  %v1735_v18 = vld [vmem:[#allocation3 + $0x88] sm:$0xff]  }
  0x23   :  { %v1724_v17 = vld [vmem:[#allocation3 + $0x20] sm:$0xff]   ;;  %v1725_v19 = vld [vmem:[#allocation3 + $0x28] sm:$0xff]   ;;  %v1737_v20 = vld [vmem:[#allocation3 + $0x90] sm:$0xff]   ;;  %p1792_p13 = por %p1791_p12, %p1790_p11 }
  0x24   :  { %1574 = vmatpush3.bf16.msra.mxu0 %v1713_v2  ;;  %1696 = vmatpush3.bf16.msra.mxu1 %v1713_v2  ;;  %v1726_v21 = vld [vmem:[#allocation3 + $0x30] sm:$0xff]   ;;  %v1739_v22 = vld [vmem:[#allocation3 + $0x98] sm:$0xff]   ;;  %v1740_v24 = vld [vmem:[#allocation3 + $0xa0] sm:$0xff]  }
  0x25   :  { %1575 = vmatprep.subr.bf16.mxu0 %v1857_v0  ;;  %1689 = vmatprep.subr.bf16.mxu1 %v1857_v0  ;;  %v1728_v23 = vld [vmem:[#allocation3 + $0x38] sm:$0xff]   ;;  %v1730_v25 = vld [vmem:[#allocation3 + $0x40] sm:$0xff]   ;;  %v1741_v26 = vld [vmem:[#allocation3 + $0xa8] sm:$0xff]   ;;  %p1793_p0 = pnand %p1792_p13, %p1786_p10 }
  0x26   :  { %v1732_v27 = vld [vmem:[#allocation3 + $0x48] sm:$0xff]   ;;  %v1742_v28 = vld [vmem:[#allocation3 + $0xb0] sm:$0xff]   ;;  %v1743_v30 = vld [vmem:[#allocation3 + $0xb8] sm:$0xff]  }
  0x27   :  { %v1734_v29 = vld [vmem:[#allocation3 + $0x50] sm:$0xff]   ;;  %v1736_v31 = vld [vmem:[#allocation3 + $0x58] sm:$0xff]   ;;  %v1744_v32 = vld [vmem:[#allocation3 + $0xc0] sm:$0xff]  }
  0x28   :  { %1576 = vmatpush3.bf16.msra.mxu0 %v1714_v3  ;;  %1697 = vmatpush3.bf16.msra.mxu1 %v1714_v3  ;;  %v1738_v33 = vld [vmem:[#allocation3 + $0x60] sm:$0xff]  }
  0x29   :  { %1577 = vmatprep.subr.bf16.mxu0 %v1857_v0  ;;  %1690 = vmatprep.subr.bf16.mxu1 %v1857_v0 }
  0x2c   :  { %1578 = vmatpush3.bf16.msra.mxu0 %v1715_v4  ;;  %1698 = vmatpush3.bf16.msra.mxu1 %v1715_v4 }
  0x2d   :  { %1579 = vmatprep.subr.bf16.mxu0 %v1857_v0  ;;  %1691 = vmatprep.subr.bf16.mxu1 %v1857_v0 }
  0x30   :  { %1580 = vmatpush3.bf16.msra.mxu0 %v1716_v5  ;;  %1699 = vmatpush3.bf16.msra.mxu1 %v1716_v5 }
  0x31   :  { %1581 = vmatprep.subr.bf16.mxu0 %v1857_v0  ;;  %1692 = vmatprep.subr.bf16.mxu1 %v1857_v0 }
  0x34   :  { %1582 = vmatpush3.bf16.msra.mxu0 %v1717_v6  ;;  %1700 = vmatpush3.bf16.msra.mxu1 %v1717_v6 }
  0x35   :  { %1583 = vmatprep.subr.bf16.mxu0 %v1857_v0  ;;  %1693 = vmatprep.subr.bf16.mxu1 %v1857_v0 }
  0x38   :  { %1584 = vmatpush3.bf16.msra.mxu0 %v1718_v7  ;;  %1701 = vmatpush3.bf16.msra.mxu1 %v1718_v7 }
  0x39   :  { %1585 = vmatprep.subr.bf16.mxu0 %v1857_v0  ;;  %1694 = vmatprep.subr.bf16.mxu1 %v1857_v0 }
  0x3c   :  { %1586 = vmatpush3.bf16.msra.mxu0 %v1719_v8  ;;  %1702 = vmatpush3.bf16.msra.mxu1 %v1719_v8 }
  0x3f   :  { %1588 = vmatmul.mubr.bf16.vlgmr.msra.gmra.mxu0 %v1720_v9  ;;  %1640 = vmatmul.mubr.bf16.vlgmr.msra.gmra.mxu1 %v1727_v10 }
  0x40   :  { %1591 = vmatprep.mubr.msk.bf16.mxu0 %vm1858_vm0, %v1857_v0  ;;  %1643 = vmatprep.mubr.msk.bf16.mxu1 %vm1858_vm0, %v1857_v0 }
  0x47   :  { %1592 = vmatmul.mubr.bf16.gmra.mxu0 %v1721_v11  ;;  %1644 = vmatmul.mubr.bf16.gmra.mxu1 %v1729_v12 }
  0x48   :  { %1595 = vmatprep.mubr.msk.bf16.mxu0 %vm1858_vm0, %v1857_v0  ;;  %1647 = vmatprep.mubr.msk.bf16.mxu1 %vm1858_vm0, %v1857_v0 }
  0x4f   :  { %1596 = vmatmul.mubr.bf16.gmra.mxu0 %v1722_v13  ;;  %1648 = vmatmul.mubr.bf16.gmra.mxu1 %v1731_v14 }
  0x50   :  { %1599 = vmatprep.mubr.msk.bf16.mxu0 %vm1858_vm0, %v1857_v0  ;;  %1651 = vmatprep.mubr.msk.bf16.mxu1 %vm1858_vm0, %v1857_v0 }
  0x57   :  { %1600 = vmatmul.mubr.bf16.gmra.mxu0 %v1723_v15  ;;  %1652 = vmatmul.mubr.bf16.gmra.mxu1 %v1733_v16 }
  0x58   :  { %1603 = vmatprep.mubr.msk.bf16.mxu0 %vm1858_vm0, %v1857_v0  ;;  %1655 = vmatprep.mubr.msk.bf16.mxu1 %vm1858_vm0, %v1857_v0 }
  0x5f   :  { %1604 = vmatmul.mubr.bf16.gmra.mxu0 %v1724_v17  ;;  %1656 = vmatmul.mubr.bf16.gmra.mxu1 %v1735_v18 }
  0x60   :  { %1607 = vmatprep.mubr.msk.bf16.mxu0 %vm1858_vm0, %v1857_v0  ;;  %1659 = vmatprep.mubr.msk.bf16.mxu1 %vm1858_vm0, %v1857_v0 }
  0x67   :  { %1608 = vmatmul.mubr.bf16.gmra.mxu0 %v1725_v19  ;;  %1660 = vmatmul.mubr.bf16.gmra.mxu1 %v1737_v20 }
  0x68   :  { %1611 = vmatprep.mubr.msk.bf16.mxu0 %vm1858_vm0, %v1857_v0  ;;  %1663 = vmatprep.mubr.msk.bf16.mxu1 %vm1858_vm0, %v1857_v0 }
  0x6f   :  { %1612 = vmatmul.mubr.bf16.gmra.mxu0 %v1726_v21  ;;  %1664 = vmatmul.mubr.bf16.gmra.mxu1 %v1739_v22 }
  0x70   :  { %1615 = vmatprep.mubr.msk.bf16.mxu0 %vm1858_vm0, %v1857_v0  ;;  %1667 = vmatprep.mubr.msk.bf16.mxu1 %vm1858_vm0, %v1857_v0 }
  0x77   :  { %1616 = vmatmul.mubr.bf16.gmra.mxu0 %v1728_v23  ;;  %1668 = vmatmul.mubr.bf16.gmra.mxu1 %v1740_v24 }
  0x78   :  { %1619 = vmatprep.mubr.msk.bf16.mxu0 %vm1858_vm0, %v1857_v0  ;;  %1671 = vmatprep.mubr.msk.bf16.mxu1 %vm1858_vm0, %v1857_v0 }
  0x7f   :  { %1620 = vmatmul.mubr.bf16.gmra.mxu0 %v1730_v25  ;;  %1672 = vmatmul.mubr.bf16.gmra.mxu1 %v1741_v26 }
  0x80   :  { %1623 = vmatprep.mubr.msk.bf16.mxu0 %vm1858_vm0, %v1857_v0  ;;  %1675 = vmatprep.mubr.msk.bf16.mxu1 %vm1858_vm0, %v1857_v0 }
  0x87   :  { %1624 = vmatmul.mubr.bf16.gmra.mxu0 %v1732_v27  ;;  %1676 = vmatmul.mubr.bf16.gmra.mxu1 %v1742_v28 }
  0x88   :  { %1627 = vmatprep.mubr.msk.bf16.mxu0 %vm1858_vm0, %v1857_v0  ;;  %1679 = vmatprep.mubr.msk.bf16.mxu1 %vm1858_vm0, %v1857_v0 }
  0x8f   :  { %1628 = vmatmul.mubr.bf16.gmra.mxu0 %v1734_v29  ;;  %1680 = vmatmul.mubr.bf16.gmra.mxu1 %v1743_v30 }
  0x90   :  { %1631 = vmatprep.mubr.msk.bf16.mxu0 %vm1858_vm0, %v1857_v0  ;;  %1683 = vmatprep.mubr.msk.bf16.mxu1 %vm1858_vm0, %v1857_v0 }
  0x97   :  { %1632 = vmatmul.mubr.bf16.gmra.mxu0 %v1736_v31  ;;  %1684 = vmatmul.mubr.bf16.gmra.mxu1 %v1744_v32 }
  0x98   :  { %1635 = vmatprep.mubr.msk.bf16.mxu0 %vm1858_vm0, %v1857_v0 }
  0x9f   :  { %1636 = vmatmul.mubr.bf16.gmra.mxu0 %v1738_v33 }
  0xff   :  { %v1965_v34 = vpop.f32.mrf.mxu0  ;;  %v1967_v35 = vpop.f32.mrf.mxu1 }
 0x101   :  { %v1589_v36 = vpop.f32.mrf.mxu0  ;;  %v1641_v37 = vpop.f32.mrf.mxu1 }
 0x102   :  { %v1105_v37 = vmul.f32 %v1965_v34, %v1965_v34 }
 0x103   :  { %v1969_v38 = vpop.f32.mrf.mxu0  ;;  %v1971_v39 = vpop.f32.mrf.mxu1 }
 0x104   :  { %v1392_v40 = vpack.c.bf16 %v1969_v38, %v1965_v34  ;;  %v1457_v41 = vpack.c.bf16 %v1971_v39, %v1967_v35  ;;  %v1106_v32 = vmul.f32 %v1969_v38, %v1969_v38 }
 0x105   :  { %v1590_v42 = vpop.f32.mrf.mxu0  ;;  %v1642_v43 = vpop.f32.mrf.mxu1 }
 0x106   :  { %1393 = vst [vmem:[#allocation8] sm:$0xff] %v1392_v40   ;;  %1526 = vst [vmem:[#allocation8 + $0x68] sm:$0xff] %v1457_v41   ;;  %v1049_v43 = vadd.f32 %v1969_v38, %v1965_v34 }
 0x107   :  { %v1977_v44 = vpop.f32.mrf.mxu0  ;;  %v1979_v45 = vpop.f32.mrf.mxu1 }
 0x108   :  { %v1107_v40 = vmul.f32 %v1977_v44, %v1977_v44 }
 0x109   :  { %v1593_v46 = vpop.f32.mrf.mxu0  ;;  %v1645_v47 = vpop.f32.mrf.mxu1 }
 0x10b   :  { %v1981_v48 = vpop.f32.mrf.mxu0  ;;  %v1983_v49 = vpop.f32.mrf.mxu1 }
 0x10c   :  { %v1397_v50 = vpack.c.bf16 %v1981_v48, %v1977_v44  ;;  %v1462_v51 = vpack.c.bf16 %v1983_v49, %v1979_v45 }
 0x10d   :  { %v1594_v52 = vpop.f32.mrf.mxu0  ;;  %v1646_v53 = vpop.f32.mrf.mxu1 }
 0x10e   :  { %1514 = vst [vmem:[#allocation8 + $0x8] sm:$0xff] %v1397_v50   ;;  %1527 = vst [vmem:[#allocation8 + $0x70] sm:$0xff] %v1462_v51   ;;  %v1155_v50 = vadd.f32 %v1106_v32, %v1105_v37  ;;  %v1108_v51 = vmul.f32 %v1981_v48, %v1981_v48 }
 0x10f   :  { %v1989_v54 = vpop.f32.mrf.mxu0  ;;  %v1991_v55 = vpop.f32.mrf.mxu1 }
 0x110   :  { %v1109_v34 = vmul.f32 %v1989_v54, %v1989_v54 }
 0x111   :  { %v1597_v56 = vpop.f32.mrf.mxu0  ;;  %v1649_v57 = vpop.f32.mrf.mxu1 }
 0x112   :  { %v1050_v56 = vadd.f32 %v1049_v43, %v1977_v44  ;;  %v1156_v57 = vadd.f32 %v1155_v50, %v1107_v40 }
 0x113   :  { %v1993_v58 = vpop.f32.mrf.mxu0  ;;  %v1995_v59 = vpop.f32.mrf.mxu1 }
 0x114   :  { %v1402_v60 = vpack.c.bf16 %v1993_v58, %v1989_v54  ;;  %v1467_v61 = vpack.c.bf16 %v1995_v59, %v1991_v55 }
 0x115   :  { %v1598_v62 = vpop.f32.mrf.mxu0  ;;  %v1650_v63 = vpop.f32.mrf.mxu1 }
 0x116   :  { %1515 = vst [vmem:[#allocation8 + $0x10] sm:$0xff] %v1402_v60   ;;  %1528 = vst [vmem:[#allocation8 + $0x78] sm:$0xff] %v1467_v61   ;;  %v1051_v61 = vadd.f32 %v1050_v56, %v1981_v48  ;;  %v1157_v62 = vadd.f32 %v1156_v57, %v1108_v51  ;;  %v1110_v63 = vmul.f32 %v1993_v58, %v1993_v58 }
 0x117   :  { %v2001_v0 = vpop.f32.mrf.mxu0  ;;  %v2003_v1 = vpop.f32.mrf.mxu1 }
 0x118   :  { %v1052_v44 = vadd.f32 %v1051_v61, %v1989_v54 }
 0x119   :  { %v1601_v2 = vpop.f32.mrf.mxu0  ;;  %v1653_v3 = vpop.f32.mrf.mxu1 }
 0x11b   :  { %v2005_v4 = vpop.f32.mrf.mxu0  ;;  %v2007_v5 = vpop.f32.mrf.mxu1 }
 0x11c   :  { %v1407_v6 = vpack.c.bf16 %v2005_v4, %v2001_v0  ;;  %v1472_v7 = vpack.c.bf16 %v2007_v5, %v2003_v1  ;;  %v1112_v54 = vmul.f32 %v2005_v4, %v2005_v4 }
 0x11d   :  { %v1602_v8 = vpop.f32.mrf.mxu0  ;;  %v1654_v9 = vpop.f32.mrf.mxu1 }
 0x11e   :  { %1516 = vst [vmem:[#allocation8 + $0x18] sm:$0xff] %v1407_v6   ;;  %1529 = vst [vmem:[#allocation8 + $0x80] sm:$0xff] %v1472_v7   ;;  %v1158_v6 = vadd.f32 %v1157_v62, %v1109_v34  ;;  %v1111_v7 = vmul.f32 %v2001_v0, %v2001_v0 }
 0x11f   :  { %v2013_v10 = vpop.f32.mrf.mxu0  ;;  %v2015_v11 = vpop.f32.mrf.mxu1 }
 0x121   :  { %v1605_v12 = vpop.f32.mrf.mxu0  ;;  %v1657_v13 = vpop.f32.mrf.mxu1 }
 0x122   :  { %v1053_v12 = vadd.f32 %v1052_v44, %v1993_v58  ;;  %v1113_v58 = vmul.f32 %v2013_v10, %v2013_v10 }
 0x123   :  { %v2017_v14 = vpop.f32.mrf.mxu0  ;;  %v2019_v15 = vpop.f32.mrf.mxu1 }
 0x124   :  { %v1412_v16 = vpack.c.bf16 %v2017_v14, %v2013_v10  ;;  %v1477_v17 = vpack.c.bf16 %v2019_v15, %v2015_v11 }
 0x125   :  { %v1606_v18 = vpop.f32.mrf.mxu0  ;;  %v1658_v19 = vpop.f32.mrf.mxu1 }
 0x126   :  { %1517 = vst [vmem:[#allocation8 + $0x20] sm:$0xff] %v1412_v16   ;;  %1530 = vst [vmem:[#allocation8 + $0x88] sm:$0xff] %v1477_v17   ;;  %v1159_v16 = vadd.f32 %v1158_v6, %v1110_v63  ;;  %v1054_v19 = vadd.f32 %v1053_v12, %v2001_v0 }
 0x127   :  { %v2025_v20 = vpop.f32.mrf.mxu0  ;;  %v2027_v21 = vpop.f32.mrf.mxu1 }
 0x128   :  { %v1115_v37 = vmul.f32 %v2025_v20, %v2025_v20 }
 0x129   :  { %v1609_v22 = vpop.f32.mrf.mxu0  ;;  %v1661_v23 = vpop.f32.mrf.mxu1 }
 0x12a   :  { %v1160_v22 = vadd.f32 %v1159_v16, %v1111_v7 }
 0x12b   :  { %v2029_v24 = vpop.f32.mrf.mxu0  ;;  %v2031_v25 = vpop.f32.mrf.mxu1 }
 0x12c   :  { %v1417_v26 = vpack.c.bf16 %v2029_v24, %v2025_v20  ;;  %v1482_v27 = vpack.c.bf16 %v2031_v25, %v2027_v21  ;;  %v1116_v51 = vmul.f32 %v2029_v24, %v2029_v24 }
 0x12d   :  { %v1610_v28 = vpop.f32.mrf.mxu0  ;;  %v1662_v29 = vpop.f32.mrf.mxu1 }
 0x12e   :  { %1518 = vst [vmem:[#allocation8 + $0x28] sm:$0xff] %v1417_v26   ;;  %1531 = vst [vmem:[#allocation8 + $0x90] sm:$0xff] %v1482_v27   ;;  %v1055_v27 = vadd.f32 %v1054_v19, %v2005_v4  ;;  %v1161_v28 = vadd.f32 %v1160_v22, %v1112_v54  ;;  %v1114_v29 = vmul.f32 %v2017_v14, %v2017_v14 }
 0x12f   :  { %v2037_v30 = vpop.f32.mrf.mxu0  ;;  %v2039_v31 = vpop.f32.mrf.mxu1 }
 0x130   :  { %v1162_v0 = vadd.f32 %v1161_v28, %v1113_v58  ;;  %v1117_v57 = vmul.f32 %v2037_v30, %v2037_v30 }
 0x131   :  { %v1613_v33 = vpop.f32.mrf.mxu0  ;;  %v1665_v36 = vpop.f32.mrf.mxu1 }
 0x132   :  { %v1056_v36 = vadd.f32 %v1055_v27, %v2013_v10  ;;  %v1163_v50 = vadd.f32 %v1162_v0, %v1114_v29 }
 0x133   :  { %v2047_v41 = vpop.f32.mrf.mxu0  ;;  %v2049_v42 = vpop.f32.mrf.mxu1 }
 0x134   :  { %v1422_v46 = vpack.c.bf16 %v2047_v41, %v2037_v30  ;;  %v1487_v47 = vpack.c.bf16 %v2049_v42, %v2039_v31  ;;  %v1164_v56 = vadd.f32 %v1163_v50, %v1115_v37  ;;  %v1118_v63 = vmul.f32 %v2047_v41, %v2047_v41 }
 0x135   :  { %v1614_v52 = vpop.f32.mrf.mxu0  ;;  %v1666_v53 = vpop.f32.mrf.mxu1 }
 0x136   :  { %1519 = vst [vmem:[#allocation8 + $0x30] sm:$0xff] %v1422_v46   ;;  %1532 = vst [vmem:[#allocation8 + $0x98] sm:$0xff] %v1487_v47   ;;  %v1057_v46 = vadd.f32 %v1056_v36, %v2017_v14  ;;  %v1165_v62 = vadd.f32 %v1164_v56, %v1116_v51 }
 0x137   :  { %v2062_v38 = vpop.f32.mrf.mxu0  ;;  %v2064_v60 = vpop.f32.mrf.mxu1 }
 0x138   :  { %v1058_v10 = vadd.f32 %v1057_v46, %v2025_v20  ;;  %v1166_v20 = vadd.f32 %v1165_v62, %v1117_v57  ;;  %v1119_v6 = vmul.f32 %v2062_v38, %v2062_v38 }
 0x139   :  { %v1617_v2 = vpop.f32.mrf.mxu0  ;;  %v1669_v3 = vpop.f32.mrf.mxu1 }
 0x13a   :  { %v1059_v61 = vadd.f32 %v1058_v10, %v2029_v24  ;;  %v1167_v16 = vadd.f32 %v1166_v20, %v1118_v63 }
 0x13b   :  { %v2072_v8 = vpop.f32.mrf.mxu0  ;;  %v2074_v9 = vpop.f32.mrf.mxu1 }
 0x13c   :  { %v1427_v48 = vpack.c.bf16 %v2072_v8, %v2062_v38  ;;  %v1492_v13 = vpack.c.bf16 %v2074_v9, %v2064_v60  ;;  %v1060_v44 = vadd.f32 %v1059_v61, %v2037_v30  ;;  %v1120_v54 = vmul.f32 %v2072_v8, %v2072_v8 }
 0x13d   :  { %v1618_v17 = vpop.f32.mrf.mxu0  ;;  %v1670_v18 = vpop.f32.mrf.mxu1  ;;  %v1168_v19 = vadd.f32 %v1167_v16, %v1119_v6 }
 0x13e   :  { %1520 = vst [vmem:[#allocation8 + $0x38] sm:$0xff] %v1427_v48   ;;  %1533 = vst [vmem:[#allocation8 + $0xa0] sm:$0xff] %v1492_v13   ;;  %v1061_v48 = vadd.f32 %v1060_v44, %v2047_v41 }
 0x13f   :  { %v511_v23 = vpop.f32.mrf.mxu0  ;;  %v2086_v26 = vpop.f32.mrf.mxu1  ;;  %v1169_v28 = vadd.f32 %v1168_v19, %v1120_v54 }
 0x140   :  { %v1062_v30 = vadd.f32 %v1061_v48, %v2062_v38  ;;  %v1121_v22 = vmul.f32 %v511_v23, %v511_v23 }
 0x141   :  { %v1621_v32 = vpop.f32.mrf.mxu0  ;;  %v1673_v33 = vpop.f32.mrf.mxu1 }
 0x142   :  { %v1063_v41 = vadd.f32 %v1062_v30, %v2072_v8  ;;  %v1170_v0 = vadd.f32 %v1169_v28, %v1121_v22 }
 0x143   :  { %v514_v40 = vpop.f32.mrf.mxu0  ;;  %v2094_v43 = vpop.f32.mrf.mxu1 }
 0x144   :  { %v1432_v47 = vpack.c.bf16 %v514_v40, %v511_v23  ;;  %v1497_v4 = vpack.c.bf16 %v2094_v43, %v2086_v26  ;;  %v1122_v29 = vmul.f32 %v514_v40, %v514_v40  ;;  %v1064_v36 = vadd.f32 %v1063_v41, %v511_v23 }
 0x145   :  { %v1622_v52 = vpop.f32.mrf.mxu0  ;;  %v1674_v53 = vpop.f32.mrf.mxu1 }
 0x146   :  { %1521 = vst [vmem:[#allocation8 + $0x40] sm:$0xff] %v1432_v47   ;;  %1534 = vst [vmem:[#allocation8 + $0xa8] sm:$0xff] %v1497_v4   ;;  %v1065_v38 = vadd.f32 %v1064_v36, %v514_v40  ;;  %v1171_v51 = vadd.f32 %v1170_v0, %v1122_v29 }
 0x147   :  { %v519_v34 = vpop.f32.mrf.mxu0  ;;  %v2104_v14 = vpop.f32.mrf.mxu1 }
 0x148   :  { %v1123_v37 = vmul.f32 %v519_v34, %v519_v34  ;;  %v1066_v8 = vadd.f32 %v1065_v38, %v519_v34 }
 0x149   :  { %v1625_v2 = vpop.f32.mrf.mxu0  ;;  %v1677_v3 = vpop.f32.mrf.mxu1 }
 0x14a   :  { %v1172_v56 = vadd.f32 %v1171_v51, %v1123_v37 }
 0x14b   :  { %v522_v7 = vpop.f32.mrf.mxu0  ;;  %v2112_v12 = vpop.f32.mrf.mxu1 }
 0x14c   :  { %v1437_v13 = vpack.c.bf16 %v522_v7, %v519_v34  ;;  %v1502_v24 = vpack.c.bf16 %v2112_v12, %v2104_v14  ;;  %v1124_v52 = vmul.f32 %v522_v7, %v522_v7  ;;  %v1067_v62 = vadd.f32 %v1066_v8, %v522_v7 }
 0x14d   :  { %v1626_v17 = vpop.f32.mrf.mxu0  ;;  %v1678_v18 = vpop.f32.mrf.mxu1 }
 0x14e   :  { %1522 = vst [vmem:[#allocation8 + $0x48] sm:$0xff] %v1437_v13   ;;  %1535 = vst [vmem:[#allocation8 + $0xb0] sm:$0xff] %v1502_v24   ;;  %v1173_v63 = vadd.f32 %v1172_v56, %v1124_v52 }
 0x14f   :  { %v527_v58 = vpop.f32.mrf.mxu0  ;;  %v2120_v27 = vpop.f32.mrf.mxu1 }
 0x150   :  { %v1125_v57 = vmul.f32 %v527_v58, %v527_v58  ;;  %v1068_v3 = vadd.f32 %v1067_v62, %v527_v58 }
 0x151   :  { %v1629_v32 = vpop.f32.mrf.mxu0  ;;  %v1681_v33 = vpop.f32.mrf.mxu1 }
 0x152   :  { %v1174_v20 = vadd.f32 %v1173_v63, %v1125_v57 }
 0x153   :  { %v530_v46 = vpop.f32.mrf.mxu0  ;;  %v2123_v47 = vpop.f32.mrf.mxu1 }
 0x154   :  { %v1442_v4 = vpack.c.bf16 %v530_v46, %v527_v58  ;;  %v1507_v50 = vpack.c.bf16 %v2123_v47, %v2120_v27  ;;  %v1126_v44 = vmul.f32 %v530_v46, %v530_v46  ;;  %v1069_v13 = vadd.f32 %v1068_v3, %v530_v46 }
 0x155   :  { %v1630_v53 = vpop.f32.mrf.mxu0  ;;  %v1682_v10 = vpop.f32.mrf.mxu1 }
 0x156   :  { %1523 = vst [vmem:[#allocation8 + $0x50] sm:$0xff] %v1442_v4   ;;  %1536 = vst [vmem:[#allocation8 + $0xb8] sm:$0xff] %v1507_v50   ;;  %v1175_v18 = vadd.f32 %v1174_v20, %v1126_v44  ;;  %v1131_v4 = vmul.f32 %v1967_v35, %v1967_v35 }
 0x157   :  { %v535_v23 = vpop.f32.mrf.mxu0  ;;  %v2127_v61 = vpop.f32.mrf.mxu1 }
 0x158   :  { %v1127_v24 = vmul.f32 %v535_v23, %v535_v23  ;;  %v1070_v30 = vadd.f32 %v1069_v13, %v535_v23 }
 0x159   :  { %v1633_v2 = vpop.f32.mrf.mxu0  ;;  %v1685_v40 = vpop.f32.mrf.mxu1 }
 0x15a   :  { %v1176_v22 = vadd.f32 %v1175_v18, %v1127_v24 }
 0x15b   :  { %v538_v6 = vpop.f32.mrf.mxu0  ;;  %v2129_v48 = vpop.f32.mrf.mxu1 }
 0x15c   :  { %v1447_v34 = vpack.c.bf16 %v538_v6, %v535_v23  ;;  %v1512_v16 = vpack.c.bf16 %v2129_v48, %v2127_v61  ;;  %v1128_v7 = vmul.f32 %v538_v6, %v538_v6  ;;  %v1071_v58 = vadd.f32 %v1070_v30, %v538_v6 }
 0x15d   :  { %v1634_v54 = vpop.f32.mrf.mxu0  ;;  %v1686_v17 = vpop.f32.mrf.mxu1 }
 0x15e   :  { %1524 = vst [vmem:[#allocation8 + $0x58] sm:$0xff] %v1447_v34   ;;  %1537 = vst [vmem:[#allocation8 + $0xc0] sm:$0xff] %v1512_v16   ;;  %v1177_v29 = vadd.f32 %v1176_v22, %v1128_v7 }
 0x15f   :  { %v543_v19 = vpop.f32.mrf.mxu0 }
 0x160   :  { %v1129_v41 = vmul.f32 %v543_v19, %v543_v19  ;;  %v1072_v32 = vadd.f32 %v1071_v58, %v543_v19 }
 0x161   :  { %v1637_v28 = vpop.f32.mrf.mxu0 }
 0x162   :  { %v1178_v36 = vadd.f32 %v1177_v29, %v1129_v41 }
 0x163   :  { %v546_v33 = vpop.f32.mrf.mxu0 }
 0x164   :  { %v1452_v0 = vpack.c.bf16 %v546_v33, %v543_v19  ;;  %v1073_v37 = vadd.f32 %v1072_v32, %v546_v33  ;;  %v1130_v46 = vmul.f32 %v546_v33, %v546_v33 }
 0x165   :  { %v1638_v38 = vpop.f32.mrf.mxu0 }
 0x166   :  { %1525 = vst [vmem:[#allocation8 + $0x60] sm:$0xff] %v1452_v0   ;;  %v1074_v50 = vadd.f32 %v1073_v37, %v1967_v35  ;;  %v1179_v51 = vadd.f32 %v1178_v36, %v1130_v46 }
 0x167   :  { %1796 = shalt.err (!%p1793_p0)
}
 0x168   :  { %1222 = dma.vmem_to_hbm [thread:$0]  %s1217_s1, 3200, %s2219_s2, [#allocation5], %s1854_s18, %s1854_s18, %s1855_s19   ;;  %v1132_v52 = vmul.f32 %v1971_v39, %v1971_v39  ;;  %v1075_v35 = vadd.f32 %v1074_v50, %v1971_v39  ;;  %v1180_v53 = vadd.f32 %v1179_v51, %v1131_v4  ;;  %v1133_v10 = vmul.f32 %v1979_v45, %v1979_v45 }
 0x169   :  { %v1134_v57 = vmul.f32 %v1983_v49, %v1983_v49  ;;  %v1135_v63 = vmul.f32 %v1991_v55, %v1991_v55  ;;  %v1136_v39 = vmul.f32 %v1995_v59, %v1995_v59  ;;  %v1144_v41 = vmul.f32 %v2049_v42, %v2049_v42  ;;  %s1860_s2 = smov [#allocation9]   ;;  %s1861_s5 = smov [#allocation11]  }
 0x16a   :  { %v1076_v8 = vadd.f32 %v1075_v35, %v1979_v45  ;;  %v1181_v56 = vadd.f32 %v1180_v53, %v1132_v52  ;;  %v1137_v45 = vmul.f32 %v2003_v1, %v2003_v1  ;;  %v1145_v32 = vmul.f32 %v2064_v60, %v2064_v60  ;;  %s1229_s30 = sshll.u32 %s1860_s2, 4  ;;  %s1239_s6 = sshll.u32 %s1861_s5, 4  ;;  %s1230_s30 = int_to_ptr.vmem [resolvable:$true] %s1229_s30  ;;  %s1240_s6 = int_to_ptr.vmem [resolvable:$true] %s1239_s6 }
 0x16b   :  { %v1146_v36 = vmul.f32 %v2074_v9, %v2074_v9  ;;  %v1147_v37 = vmul.f32 %v2086_v26, %v2086_v26  ;;  %v1148_v38 = vmul.f32 %v2094_v43, %v2094_v43  ;;  %v1149_v50 = vmul.f32 %v2104_v14, %v2104_v14  ;;  %s1805_s7 = scalar_lea.vmem %s1230_s30, 16  ;;  %s1809_s8 = scalar_lea.vmem %s1230_s30, 32 }
 0x16c   :  { %v1077_v23 = vadd.f32 %v1076_v8, %v1983_v49  ;;  %v1182_v62 = vadd.f32 %v1181_v56, %v1133_v10  ;;  %v1138_v49 = vmul.f32 %v2007_v5, %v2007_v5  ;;  %v1150_v52 = vmul.f32 %v2112_v12, %v2112_v12  ;;  %p1806_p1 = scmp.ne.s32.totalorder %s1230_s30, %s1805_s7  ;;  %p1810_p2 = scmp.lt.s32.totalorder %s1230_s30, %s1230_s30 }
 0x16d   :  { %v1151_v53 = vmul.f32 %v2120_v27, %v2120_v27  ;;  %v1152_v8 = vmul.f32 %v2123_v47, %v2123_v47  ;;  %p1811_p3 = scmp.lt.s32.totalorder %s1809_s8, %s1805_s7 }
 0x16e   :  { %v1078_v2 = vadd.f32 %v1077_v23, %v1991_v55  ;;  %v1183_v40 = vadd.f32 %v1182_v62, %v1134_v57  ;;  %v1139_v55 = vmul.f32 %v2015_v11, %v2015_v11  ;;  %v1153_v57 = vmul.f32 %v2127_v61, %v2127_v61 }
 0x16f   :  { %v1154_v62 = vmul.f32 %v2129_v48, %v2129_v48  ;;  %p1812_p4 = por %p1811_p3, %p1810_p2 }
 0x170   :  { %v1079_v3 = vadd.f32 %v1078_v2, %v1995_v59  ;;  %v1184_v44 = vadd.f32 %v1183_v40, %v1135_v63  ;;  %v1140_v59 = vmul.f32 %v2019_v15, %v2019_v15 }
 0x171   :  { %p1813_p5 = pnand %p1812_p4, %p1806_p1 }
 0x172   :  { %v1185_v20 = vadd.f32 %v1184_v44, %v1136_v39  ;;  %v1080_v6 = vadd.f32 %v1079_v3, %v2003_v1  ;;  %v1141_v1 = vmul.f32 %v2027_v21, %v2027_v21 }
 0x174   :  { %v1081_v13 = vadd.f32 %v1080_v6, %v2007_v5  ;;  %v1186_v24 = vadd.f32 %v1185_v20, %v1137_v45  ;;  %v1142_v5 = vmul.f32 %v2031_v25, %v2031_v25 }
 0x176   :  { %v1082_v34 = vadd.f32 %v1081_v13, %v2015_v11  ;;  %v1187_v16 = vadd.f32 %v1186_v24, %v1138_v49  ;;  %v1143_v11 = vmul.f32 %v2039_v31, %v2039_v31 }
 0x178   :  { %v1083_v54 = vadd.f32 %v1082_v34, %v2019_v15  ;;  %v1188_v17 = vadd.f32 %v1187_v16, %v1139_v55 }
 0x17a   :  { %v1084_v18 = vadd.f32 %v1083_v54, %v2027_v21  ;;  %v1189_v30 = vadd.f32 %v1188_v17, %v1140_v59 }
 0x17c   :  { %v1085_v7 = vadd.f32 %v1084_v18, %v2031_v25  ;;  %v1190_v19 = vadd.f32 %v1189_v30, %v1141_v1 }
 0x17e   :  { %v1086_v22 = vadd.f32 %v1085_v7, %v2039_v31  ;;  %v1191_v58 = vadd.f32 %v1190_v19, %v1142_v5 }
 0x180   :  { %v1087_v15 = vadd.f32 %v1086_v22, %v2049_v42  ;;  %v1192_v28 = vadd.f32 %v1191_v58, %v1143_v11 }
 0x182   :  { %v1193_v21 = vadd.f32 %v1192_v28, %v1144_v41  ;;  %v1088_v29 = vadd.f32 %v1087_v15, %v2064_v60 }
 0x184   :  { %v1194_v25 = vadd.f32 %v1193_v21, %v1145_v32  ;;  %v1089_v33 = vadd.f32 %v1088_v29, %v2074_v9 }
 0x186   :  { %v1195_v31 = vadd.f32 %v1194_v25, %v1146_v36  ;;  %v1090_v0 = vadd.f32 %v1089_v33, %v2086_v26 }
 0x188   :  { %v1196_v42 = vadd.f32 %v1195_v31, %v1147_v37  ;;  %v1091_v46 = vadd.f32 %v1090_v0, %v2094_v43 }
 0x18a   :  { %v1197_v4 = vadd.f32 %v1196_v42, %v1148_v38  ;;  %v1092_v60 = vadd.f32 %v1091_v46, %v2104_v14 }
 0x18c   :  { %v1198_v51 = vadd.f32 %v1197_v4, %v1149_v50  ;;  %v1093_v9 = vadd.f32 %v1092_v60, %v2112_v12 }
 0x18e   :  { %v1199_v35 = vadd.f32 %v1198_v51, %v1150_v52  ;;  %v1094_v26 = vadd.f32 %v1093_v9, %v2120_v27 }
 0x190   :  { %v1200_v10 = vadd.f32 %v1199_v35, %v1151_v53  ;;  %v1095_v43 = vadd.f32 %v1094_v26, %v2123_v47 }
 0x192   :  { %v1201_v56 = vadd.f32 %v1200_v10, %v1152_v8  ;;  %v1096_v14 = vadd.f32 %v1095_v43, %v2127_v61 }
 0x194   :  { %v1202_v23 = vadd.f32 %v1201_v56, %v1153_v57  ;;  %v1097_v12 = vadd.f32 %v1096_v14, %v2129_v48 }
 0x196   :  { %v1098_v63 = vrot.slane %v1097_v12, 4  ;;  %v1203_v27 = vadd.f32 %v1202_v23, %v1154_v62 }
 0x198   :  { %v1099_v2 = vadd.f32 %v1098_v63, %v1097_v12  ;;  %v1204_v40 = vrot.slane %v1203_v27, 4 }
 0x19a   :  { %v1100_v39 = vrot.slane %v1099_v2, 2  ;;  %v1205_v3 = vadd.f32 %v1204_v40, %v1203_v27 }
 0x19c   :  { %v1101_v44 = vadd.f32 %v1100_v39, %v1099_v2  ;;  %v1206_v47 = vrot.slane %v1205_v3, 2 }
 0x19e   :  { %v1102_v45 = vrot.slane %v1101_v44, 1  ;;  %v1207_v20 = vadd.f32 %v1206_v47, %v1205_v3 }
 0x1a0   :  { %v1103_v61 = vadd.f32 %v1102_v45, %v1101_v44  ;;  %v1208_v6 = vrot.slane %v1207_v20, 1 }
 0x1a2   :  { %1104 = vst [vmem:[#allocation9] sm:$0x1] %v1103_v61  ;;  %v1209_v49 = vadd.f32 %v1208_v6, %v1207_v20 }
 0x1a3   :  { %1816 = shalt.err (!%p1813_p5)
}
 0x1a4   :  { %1232 = dma.vmem_to_hbm [thread:$0]  %s1230_s30, 16, %s2220_s3, [#allocation10]   ;;  %1210 = vst [vmem:[#allocation11] sm:$0x1] %v1209_v49 }
 0x1a5   :  { %s1825_s11 = scalar_lea.vmem %s1240_s6, 16  ;;  %s1829_s12 = scalar_lea.vmem %s1240_s6, 32 }
 0x1a6   :  { %p1826_p6 = scmp.ne.s32.totalorder %s1240_s6, %s1825_s11  ;;  %p1830_p7 = scmp.lt.s32.totalorder %s1240_s6, %s1240_s6 }
 0x1a7   :  { %p1831_p8 = scmp.lt.s32.totalorder %s1829_s12, %s1825_s11 }
 0x1a9   :  { %p1832_p9 = por %p1831_p8, %p1830_p7 }
 0x1ab   :  { %p1833_p10 = pnand %p1832_p9, %p1826_p6 }
 0x1ad   :  { %1836 = shalt.err (!%p1833_p10)
}
 0x1ae   :  { %1242 = dma.vmem_to_hbm [thread:$0]  %s1240_s6, 16, %s2221_s4, [#allocation10]  }
 0x1af   :  { %1849 = dma.done.wait [#allocation5], 3200  }
 0x1b0   :  { %1850 = vsyncadd [#allocation5], 4294964096 }
 0x1b1   :  { %1851 = dma.done.wait [#allocation10], 32  }
 0x1b2   :  { %1852 = vsyncadd [#allocation10], 4294967264 }
 0x1b3   :  { %1252 = vsyncpa [#allocation4], 1 }
 0x1b4   :  { %1253 = vsyncpa [#allocation7], 1 }
 0x1b5   :  { %1254 = vsyncpa [#allocation5], 1 }
 0x1b6   :  { %1255 = vsyncpa [#allocation10], 1 }

</bundles_post_ra>
